<compile_context>
chip_gen: v7x
topology: tpu7x:2x2x1
jax: 0.10.0
libtpu: 0.0.40
codegen_flags: <defaults>
</compile_context>

<pallas_src>
import functools

import numpy as np
import jax
import jax.numpy as jnp
from jax import lax
from jax.experimental import pallas as pl
from jax.experimental.pallas import tpu as pltpu


# ----------------------------- PE table (module init analog) -----------------


def _make_sinusoidal_pe(max_len: int, d_model: int,
                        dtype=jnp.float32) -> jnp.ndarray:
    """Deterministic PE table, identical math to the PyTorch __init__.

    Build it once, in the activation dtype, at "module init" time so the
    per-call wrapper never pays a slice/cast HBM pass.
    """
    position = jnp.arange(max_len, dtype=jnp.float32)[:, None]            # (L, 1)
    div_term = jnp.exp(
        jnp.arange(0, d_model, 2, dtype=jnp.float32)
        * (-np.log(10000.0) / d_model)
    )                                                                      # (D/2,)
    pe = jnp.zeros((max_len, d_model), dtype=jnp.float32)
    pe = pe.at[:, 0::2].set(jnp.sin(position * div_term))
    pe = pe.at[:, 1::2].set(jnp.cos(position * div_term))
    return pe.astype(dtype)


# ----------------------------- tiling helpers ---------------------------------


def _vmem_budget_and_limit() -> tuple[int, int]:
    """Generation-aware (budget, vmem_limit) in bytes.

    128 MiB VMEM (v5e/v6e) -> 64 MiB limit / 56 MiB tile budget.
     64 MiB VMEM (v7x)     -> 32 MiB limit / 24 MiB tile budget.
    Off-TPU (interpret/CPU) -> conservative v7x-level numbers.
    """
    try:
        cap = int(pltpu.get_tpu_info().vmem_capacity_bytes)
        if cap <= 0:
            raise ValueError("bad vmem capacity")
    except Exception:
        cap = 64 << 20
    limit = min(cap // 2, 96 << 20)
    budget = max(8 << 20, limit - (8 << 20))      # headroom for pipeline bookkeeping
    return budget, limit


def _choose_tiles(b: int, s: int, d: int, itemsize: int,
                  budget: int) -> tuple[int, int]:
    """Pick (seq_tile, batch_tile).

    Budget accounting per grid step (double-buffered x and out, PE tile shared
    across the inner batch axis): ~ (4*bt + 2) * ts * d * itemsize bytes.
    """
    sub = max(8, 32 // max(1, itemsize))          # 8 f32, 16 bf16, 32 int8/fp8
    row_bytes = max(1, d * itemsize)
    max_ts = budget // (6 * row_bytes)            # with bt = 1

    if max_ts >= s:
        ts, bt = s, 1
        if b == 1 and s > sub:
            # Single-step grids leave one v7x TensorCore idle: split the seq tile.
            half = -(-s // 2)
            cand = -(-half // sub) * sub          # round half UP to sublane multiple
            if cand < s:
                ts = cand
        elif b > 1:
            # Whole sequence fits in one tile: block over batch too (bigger DMAs,
            # fewer grid steps), but keep >= 2 grid steps for v7x's two TCs.
            for cand in range(b // 2, 1, -1):
                if b % cand == 0 and (4 * cand + 2) * s * row_bytes <= budget:
                    bt = cand
                    break
    else:
        ts = max(sub, (max_ts // sub) * sub)      # sublane-aligned; ragged last block
        bt = 1
    return ts, bt


# ----------------------------- kernel ------------------------------------------

# splitmix/murmur-style mixing constants, expressed as wrapped int32 Python ints.
def _as_i32(c: int) -> int:
    return ((c + 2 ** 31) % 2 ** 32) - 2 ** 31


_K1 = _as_i32(0x9E3779B9)
_K2 = _as_i32(0x85EBCA77)
_K3 = _as_i32(0xC2B2AE3D)
_M1 = _as_i32(0x85EBCA6B)
_M2 = _as_i32(0xC2B2AE35)


def _pe_kernel(seed_ref, x_ref, pe_ref, o_ref, *, dropout_p: float,
               apply_dropout: bool, use_hw_prng: bool):
    """One (seq_tile, batch_tile) grid step.

    x_ref, o_ref: (BT, TS, D) VMEM tiles.
    pe_ref:       (TS, D) VMEM tile, resident across the inner batch axis.
    seed_ref:     scalar-prefetch int32 seed in SMEM.
    """
    y = x_ref[...] + pe_ref[...]                  # (BT,TS,D) + (TS,D) broadcasts

    if apply_dropout:
        si = pl.program_id(0)
        bi = pl.program_id(1)
        shape = y.shape

        if use_hw_prng:
            # Real-TPU path: hardware PRNG (cheap, frees VPU slots on v7x).
            pltpu.prng_seed(seed_ref[0], si, bi)   # multi-word seed decorrelates tiles
            bits = pltpu.prng_random_bits(shape)
            if bits.dtype != jnp.uint32:
                bits = pltpu.bitcast(bits, jnp.uint32)
            thr = jnp.uint32(min(int(round(dropout_p * 2.0 ** 32)), 2 ** 32 - 1))
            keep = bits >= thr                     # P(keep) = 1 - p
        else:
            # Portable counter-based hash (int32 splitmix) so the same kernel
            # also runs under CPU / interpret mode where prng_seed is unavailable.
            bt, ts, _ = shape
            gb = lax.broadcasted_iota(jnp.int32, shape, 0) + bi * bt
            gr = lax.broadcasted_iota(jnp.int32, shape, 1) + si * ts
            gc = lax.broadcasted_iota(jnp.int32, shape, 2)
            h = seed_ref[0] + gb * _K1 + gr * _K2 + gc * _K3
            h = h ^ lax.shift_right_logical(h, jnp.int32(16))
            h = h * _M1
            h = h ^ lax.shift_right_logical(h, jnp.int32(13))
            h = h * _M2
            h = h ^ lax.shift_right_logical(h, jnp.int32(16))
            # Signed-threshold equivalent of "uniform u32 < p * 2^32".
            thr_s = int(round(dropout_p * 2.0 ** 32)) - 2 ** 31
            thr_s = max(-2 ** 31, min(2 ** 31 - 1, thr_s))
            keep = h >= jnp.int32(thr_s)           # P(keep) = 1 - p

        scale = 1.0 / (1.0 - dropout_p)            # inverted dropout, f32 compute
        y = jnp.where(keep, y.astype(jnp.float32) * scale, 0.0)

    o_ref[...] = y.astype(o_ref.dtype)


# ----------------------------- wrapper ------------------------------------------


def positional_encoding(x: jnp.ndarray,
                        pe_table: jnp.ndarray,
                        *,
                        dropout_p: float = 0.1,
                        training: bool = False,
                        seed: int = 0,
                        donate_x: bool = False,
                        seq_tile: int | None = None) -> jnp.ndarray:
    """Pallas equivalent of PositionalEncoding.forward.

    x:        [batch, seq_len, d_model]
    pe_table: [max_len, d_model]  (max_len >= seq_len; ideally already in x.dtype)
    training=False reproduces module.eval() (dropout is identity).
    donate_x=True aliases x to the output (input_output_aliases) for callers
    that no longer need x.
    seq_tile is a test/tuning override for the seq tile size.
    """
    b, s, d = x.shape
    if s > pe_table.shape[0]:
        raise ValueError(f"seq_len {s} exceeds pe_table max_len {pe_table.shape[0]}")
    if pe_table.shape[1] != d:
        raise ValueError("pe_table d_model mismatch")
    if not (0.0 <= dropout_p <= 1.0):
        raise ValueError(f"dropout_p must be in [0, 1], got {dropout_p}")
    if training and dropout_p >= 1.0:
        return jnp.zeros_like(x)                   # nn.Dropout(p=1.0) drops everything

    itemsize = jnp.dtype(x.dtype).itemsize
    budget, vmem_limit = _vmem_budget_and_limit()
    if seq_tile is not None:
        ts, bt = min(int(seq_tile), s), 1
    else:
        ts, bt = _choose_tiles(b, s, d, itemsize, budget)

    # PE table is passed un-sliced (block indices stay within the first s rows),
    # except when a full-seq tile is not sublane-aligned: then slice so the pe
    # block dim equals the full array dim (satisfies the (8,128) rule).
    pe = pe_table
    if ts == s and (s % 8 != 0) and pe.shape[0] != s:
        pe = pe[:s, :]
    if pe.dtype != x.dtype:
        # Callers should build the table in x.dtype at init; this is a fallback.
        pe = pe.astype(x.dtype)

    num_seq_tiles = pl.cdiv(s, ts)                 # ragged last block is masked
    num_batch_tiles = pl.cdiv(b, bt)

    seed_arr = jnp.asarray([seed], dtype=jnp.int32)
    apply_dropout = bool(training and dropout_p > 0.0)
    use_hw_prng = (jax.default_backend() == "tpu")
    # TODO(synk): on v7x, draw one 32-bit word per pair of bf16 elements to halve
    # PRNG throughput in the hardware-PRNG path.

    kernel = functools.partial(
        _pe_kernel,
        dropout_p=float(dropout_p),
        apply_dropout=apply_dropout,
        use_hw_prng=use_hw_prng,
    )

    grid_spec = pltpu.PrefetchScalarGridSpec(
        num_scalar_prefetch=1,                     # seed -> SMEM
        grid=(num_seq_tiles, num_batch_tiles),     # seq tile OUTER, batch INNER
        in_specs=[
            # x: (bt, ts, d) tile; lane-dense last dim (full d_model).
            pl.BlockSpec((bt, ts, d), lambda si, bi, seed: (bi, si, 0)),
            # pe: block index depends only on the OUTER axis -> stays resident
            # across the inner batch loop (fetched once per seq tile).
            pl.BlockSpec((ts, d), lambda si, bi, seed: (si, 0)),
        ],
        out_specs=pl.BlockSpec((bt, ts, d), lambda si, bi, seed: (bi, si, 0)),
    )

    return pl.pallas_call(
        kernel,
        out_shape=jax.ShapeDtypeStruct((b, s, d), x.dtype),
        grid_spec=grid_spec,
        input_output_aliases=({1: 0} if donate_x else {}),   # x is input idx 1
        compiler_params=pltpu.CompilerParams(
            # No cross-step state -> both axes parallel (uses both TCs on v7x;
            # neutral on single-TC v5e/v6e).
            dimension_semantics=("parallel", "parallel"),
            vmem_limit_bytes=vmem_limit,
        ),
    )(seed_arr, x, pe)


# ----------------------------- self-test ----------------------------------------


if __name__ == "__main__":
    d_model = 128          # lane-dense last dim (multiple of 128)
    max_len = 64
    batch, seq = 2, 16

    key = jax.random.PRNGKey(0)
    x = jax.random.normal(key, (batch, seq, d_model), dtype=jnp.float32)
    pe_table = _make_sinusoidal_pe(max_len, d_model, dtype=x.dtype)

    # 1) Inference path (dropout == identity), matching module.eval().
    out = jax.block_until_ready(
        positional_encoding(x, pe_table, dropout_p=0.1, training=False))
    ref = np.asarray(x) + np.asarray(pe_table)[None, :seq, :]
    assert out.shape == (batch, seq, d_model) and out.dtype == x.dtype
    np.testing.assert_allclose(np.asarray(out), ref, rtol=1e-6, atol=1e-6)

    # 2) Ragged seq tiling (cdiv grid + masked last block), eval mode.
    seq2 = 24
    x2 = jax.random.normal(jax.random.PRNGKey(1), (batch, seq2, d_model),
                           dtype=jnp.float32)
    out2 = jax.block_until_ready(
        positional_encoding(x2, pe_table, dropout_p=0.1, training=False,
                            seq_tile=16))
    ref2 = np.asarray(x2) + np.asarray(pe_table)[None, :seq2, :]
    np.testing.assert_allclose(np.asarray(out2), ref2, rtol=1e-6, atol=1e-6)

    # 3) Training-mode dropout: every element is either 0 or ref/(1-p), and the
    #    drop fraction is statistically sane.
    p = 0.5
    out_tr = np.asarray(jax.block_until_ready(
        positional_encoding(x, pe_table, dropout_p=p, training=True, seed=123)))
    assert out_tr.shape == x.shape and out_tr.dtype == x.dtype
    ref_scaled = ref / (1.0 - p)
    is_zero = out_tr == 0.0
    is_scaled = np.abs(out_tr - ref_scaled) <= 1e-4 * (1.0 + np.abs(ref_scaled))
    assert np.all(is_zero | is_scaled), "dropout output not in {0, x/(1-p)}"
    zero_frac = is_zero.mean()
    assert 0.3 < zero_frac < 0.7, f"unexpected drop fraction {zero_frac}"

    print("KERNEL_OK")
</pallas_src>

<mosaic_0001>
module attributes {stable_mosaic.version = 11 : i64} {
  func.func @_pe_kernel(%arg0: i32, %arg1: i32, %arg2: memref<1xi32, #tpu.memory_space<smem>>, %arg3: memref<1x16x128xf32, #tpu.memory_space<vmem>>, %arg4: memref<16x128xf32, #tpu.memory_space<vmem>>, %arg5: memref<1x16x128xf32, #tpu.memory_space<vmem>>) attributes {dimension_semantics = [#tpu.dimension_semantics<parallel>, #tpu.dimension_semantics<parallel>], iteration_bounds = array<i64: 1, 2>, scalar_prefetch = 1 : i64, scratch_operands = 0 : i64, tpu.core_type = #tpu.core_type<tc>, window_params = [{transform_indices = @transform_0, window_bounds = array<i64: 1, 16, 128>}, {transform_indices = @transform_1, window_bounds = array<i64: 16, 128>}, {transform_indices = @transform_2, window_bounds = array<i64: 1, 16, 128>}]} {
    %c0 = arith.constant 0 : index
    %c0_0 = arith.constant 0 : index
    %c0_1 = arith.constant 0 : index
    %0 = vector.load %arg3[%c0, %c0_0, %c0_1] : memref<1x16x128xf32, #tpu.memory_space<vmem>>, vector<1x16x128xf32>
    %c0_2 = arith.constant 0 : index
    %c0_3 = arith.constant 0 : index
    %1 = vector.load %arg4[%c0_2, %c0_3] : memref<16x128xf32, #tpu.memory_space<vmem>>, vector<16x128xf32>
    %2 = vector.shape_cast %1 : vector<16x128xf32> to vector<1x16x128xf32>
    %3 = arith.addf %0, %2 : vector<1x16x128xf32>
    %c0_4 = arith.constant 0 : index
    %c0_5 = arith.constant 0 : index
    %c0_6 = arith.constant 0 : index
    %4 = vector.load %arg5[%c0_4, %c0_5, %c0_6] : memref<1x16x128xf32, #tpu.memory_space<vmem>>, vector<1x16x128xf32>
    tpu.vector_store %arg5[%c0_4, %c0_5, %c0_6], %3 {strides = array<i32>} : memref<1x16x128xf32, #tpu.memory_space<vmem>>, vector<1x16x128xf32>,
    return
  }
  func.func @transform_0(%arg0: i32, %arg1: i32, %arg2: memref<1xi32, #tpu.memory_space<smem>>) -> (i32, i32, i32) {
    %c0_i32 = arith.constant 0 : i32
    %c0_i32_0 = arith.constant 0 : i32
    return %arg1, %arg0, %c0_i32 : i32, i32, i32
  }
  func.func @transform_1(%arg0: i32, %arg1: i32, %arg2: memref<1xi32, #tpu.memory_space<smem>>) -> (i32, i32) {
    %c0_i32 = arith.constant 0 : i32
    %c0_i32_0 = arith.constant 0 : i32
    return %arg0, %c0_i32 : i32, i32
  }
  func.func @transform_2(%arg0: i32, %arg1: i32, %arg2: memref<1xi32, #tpu.memory_space<smem>>) -> (i32, i32, i32) {
    %c0_i32 = arith.constant 0 : i32
    %c0_i32_0 = arith.constant 0 : i32
    return %arg1, %arg0, %c0_i32 : i32, i32, i32
  }
}

</mosaic_0001>

<bundles_post_ra>
// kernel: tpu_custom_call.1
= control target key start
LH: loop header
LB: loop body
LE: loop exit
PB: predicated region body
PF: predicated region fallthrough
CT: control target
= control target key end

     0   :  { %9 = vsyncpa [#allocation5], 0  ;;  %s835_s0 = inlined_call_operand.<no memory space> [shape: s32[1], index: 0, kind: input, shape index: {}]   ;;  %s836_s1 = inlined_call_operand.hbm [shape: f32[2,16,128], index: 1, kind: input, shape index: {}]   ;;  %s837_s2 = inlined_call_operand.hbm [shape: f32[64,128], index: 2, kind: input, shape index: {}]   ;;  %s838_s3 = inlined_call_operand.hbm [shape: f32[2,16,128], index: 3, kind: output, shape index: {}]  }
   0x1   :  { %11 = vsyncpa [#allocation5 + $0x1], 0 }
   0x2   :  { %12 = vsyncpa [#allocation8], 0 }
   0x3   :  { %13 = vsyncpa [#allocation6], 0 }
   0x4   :  { %15 = vsyncpa [#allocation6 + $0x1], 0  ;;  %s600_s12 = smov 0   ;;  %s602_s13 = smov 0  }
   0x5   :  { %s604_s14 = smov 0   ;;  %s606_s0 = smov 0  }
   0x6   :  { %s608_s15 = smov 0   ;;  %s610_s16 = smov 0  }
   0x7 LB: > { %s331_s17 = sadd.s32 4294967295, %s571_s16   ;;  %s332_s18 = sadd.s32 4294967294, %s571_s16   ;;  %s571_s16 = sphi %s610_s16, %s21_s16   ;;  %s567_s15 = sphi %s608_s15, %s862_s15   ;;  %s563_s0 = sphi %s606_s0, %s861_s0   ;;  %s559_s14 = sphi %s604_s14, %s860_s14   ;;  %s555_s13 = sphi %s602_s13, %s859_s13   ;;  %s551_s12 = sphi %s600_s12, %s858_s12  }
   0x8   : > { %p55_p0 = scmp.ne.s32.totalorder %s555_s13, %s551_s12  ;;  %p634_p1 = scmp.eq.s32.totalorder %s331_s17, 0 }
   0x9   : > { %p638_p2 = scmp.eq.s32.totalorder %s331_s17, 1  ;;  %p113_p3 = scmp.eq.s32.totalorder %s332_s18, 1 }
   0xa   : > { %s843_s19 = scalar_select %p634_p1, 1, 0 }
   0xb   : > { %s844_s20 = scalar_select %p638_p2, 1, 0 }
   0xc   : > { %p644_p4 = por %p634_p1, %p55_p0  ;;  %p333_p5 = scmp.ge.s32.totalorder %s571_s16, 1 }
   0xd   : > { %p649_p6 = por %p113_p3, %p55_p0  ;;  %p120_p7 = scmp.lt.s32.totalorder %s571_s16, 3 }
   0xe   : > { %s845_s21 = scalar_select %p644_p4, 1, 0 }
   0xf   : > { %s846_s22 = scalar_select %p649_p6, 1, 0 }
  0x10   : > { %p654_p8 = pnand %p333_p5, %p120_p7  ;;  %s573_s24 = smov [#allocation7]  }
  0x11   : > { %s135_s25 = sshll.u32 %s573_s24, 4  ;;  %s30_s27 = sadd.s32 1, %s567_s15  ;;  %s658_s25 = int_to_ptr.vmem [resolvable:$true] %s135_s25 }
  0x12   : > { %s847_s23 = scalar_select %p654_p8, 1, 0 }
  0x13   : > { %p358_p9 = pneg %p654_p8  ;;  %s427_s30 = scalar_lea.hbm %s837_s2, 256 }
  0x14   : > { %p428_p12 = scmp.ne.s32.totalorder %s837_s2, %s427_s30  ;;  %s432_s8 = scalar_lea.hbm %s837_s2, 1024 }
  0x15   : > { %p665_p11 = pnand %p358_p9, %p634_p1  ;;  %p433_p5 = scmp.lt.u32.totalorder %s432_s8, %s427_s30 }
  0x16   : > { %p434_p7 = scmp.lt.u32.totalorder %s427_s30, %s837_s2 }
  0x17   : > { %p429_p13 = pneg %p665_p11 }
  0x18   : > { %p435_p9 = por %p434_p7, %p433_p5 }
  0x19   : > { %p430_p0 = pnand %p429_p13, %p428_p12 }
  0x1b   : > { %p431_p3 = pneg %p430_p0 }
  0x1d   : > { %p436_p10 = pnand %p435_p9, %p431_p3 }
  0x1f   : > { %439 = shalt.err (!%p436_p10)
}
  0x20   : > { %s440_s11 = scalar_lea.vmem %s658_s25, 256  ;;  %p448_p0 = scmp.lt.s32.totalorder %s658_s25, %s658_s25 }
  0x21   : > { %p441_p6 = scmp.ne.s32.totalorder %s658_s25, %s440_s11  ;;  %p449_p4 = scmp.lt.s32.totalorder %s440_s11, %s440_s11 }
  0x23   : > { %p443_p1 = pnand %p441_p6, %p429_p13  ;;  %p450_p8 = por %p449_p4, %p448_p0 }
  0x25   : > { %p444_p12 = pneg %p443_p1 }
  0x27   : > { %p451_p2 = pnand %p450_p8, %p444_p12 }
  0x29   : > { %454 = shalt.err (!%p451_p2)
}
  0x2a   : > { %s574_s17 = smov 128   ;;  %s575_s18 = smov 8  }
  0x2b   : > { %361 = dma.hbm_to_vmem [thread:$0]  (!%p665_p11), %s837_s2, 256, %s658_s25, [#allocation8], %s574_s17, %s574_s17, %s575_s18  }
  0x2c   : > { %p31_p1 = scmp.ge.s32.totalorder %s30_s27, 2  ;;  %s42_s29 = sadd.s32 1, %s559_s14 }
  0x2d   : > { %p49_p2 = scmp.ne.s32.totalorder %s559_s14, %s555_s13  ;;  %p50_p4 = scmp.eq.s32.totalorder %s571_s16, 0 }
  0x2e   : > { %s864_s27 = smov (%p31_p1, %s30_s27), 0  ;;  %p850_p8 = scmp.ne.s32.totalorder %s844_s20, 0 }
  0x2f   : > { %p703_p6 = por %p50_p4, %p49_p2  ;;  %s37_s4 = ssub.s32 %s567_s15, %s864_s27 }
  0x30   : > { %p709_p10 = por %p850_p8, %p49_p2  ;;  %p371_p13 = scmp.lt.s32.totalorder %s571_s16, 2 }
  0x31   : > { %p40_p11 = scmp.eq.s32.totalorder %s37_s4, 0  ;;  %s149_s25 = sand.u32 1, %s559_s14  }
  0x32   : > { %s336_s5 = sshll.u32 %s149_s25, 4  ;;  %s348_s7 = sshll.u32 %s567_s15, 8 }
  0x33   : > { %s718_s6 = scalar_select %p40_p11, %s559_s14, %s42_s29  }
  0x34   : > { %s724_s10 = scalar_lea.hbm %s836_s1, %s348_s7  ;;  %s153_s20 = scalar_lea.vmem [#allocation4], %s336_s5 }
  0x35   : > { %s162_s11 = sshll.u32 %s153_s20, 4  ;;  %p730_p3 = pnand %p371_p13, %p703_p6  ;;  %s726_s11 = int_to_ptr.vmem [resolvable:$true] %s162_s11 }
  0x36   : > { %s734_s28 = scalar_lea.sflag [#allocation5], %s149_s25  ;;  %s455_s29 = scalar_lea.hbm %s724_s10, 256 }
  0x37   : > { %p456_p5 = scmp.ne.s32.totalorder %s724_s10, %s455_s29  ;;  %p457_p7 = pneg %p730_p3 }
  0x38   : > { %s460_s30 = scalar_lea.hbm %s836_s1, 512  ;;  %p461_p0 = scmp.lt.u32.totalorder %s724_s10, %s836_s1 }
  0x39   : > { %p458_p9 = pnand %p457_p7, %p456_p5  ;;  %p462_p1 = scmp.lt.u32.totalorder %s460_s30, %s455_s29 }
  0x3a   : > { %p464_p4 = scmp.lt.u32.totalorder %s455_s29, %s724_s10 }
  0x3b   : > { %p459_p12 = pneg %p458_p9  ;;  %p463_p2 = por %p462_p1, %p461_p0 }
  0x3d   : > { %p465_p6 = por %p464_p4, %p463_p2 }
  0x3f   : > { %p466_p8 = pnand %p465_p6, %p459_p12 }
  0x41   : > { %469 = shalt.err (!%p466_p8)
}
  0x42   : > { %s470_s25 = scalar_lea.vmem %s726_s11, 256  ;;  %s576_s9 = smov [#allocation4]  }
  0x43   : > { %p471_p13 = scmp.ne.s32.totalorder %s726_s11, %s470_s25  ;;  %s475_s20 = sshll.u32 %s576_s9, 4  ;;  %s476_s20 = int_to_ptr.vmem [resolvable:$false] %s475_s20 }
  0x44   : > { %s477_s4 = scalar_lea.vmem %s476_s20, 512  ;;  %p478_p9 = scmp.lt.s32.totalorder %s726_s11, %s476_s20 }
  0x45   : > { %p473_p11 = pnand %p471_p13, %p457_p7  ;;  %p479_p0 = scmp.lt.s32.totalorder %s477_s4, %s470_s25 }
  0x47   : > { %p474_p5 = pneg %p473_p11  ;;  %p480_p1 = por %p479_p0, %p478_p9 }
  0x49   : > { %p481_p2 = pnand %p480_p1, %p474_p5 }
  0x4b   : > { %484 = shalt.err (!%p481_p2)
}
  0x4c   : > { %365 = dma.hbm_to_vmem [thread:$0]  (!%p730_p3), %s724_s10, 256, %s726_s11, %s734_s28, %s574_s17, %s574_s17, %s575_s18  }
  0x4d   : > { %p853_p7 = scmp.ne.s32.totalorder %s847_s23, 0 }
  0x4e   : > { %s768_s29 = sand.u32 (!%p853_p7), 1, %s555_s13   ;;  %p854_p12 = scmp.ne.s32.totalorder (!%p853_p7), %s845_s21, 0 }
  0x4f   : > { %174 = sbr.rel (%p853_p7) target bundleno = 116 (0x74), region = 28  ;;  %s340_s5 = sshll.u32 (!%p853_p7), %s768_s29, 4 }
  0x50   : > { %s177_s30 = scalar_lea.sflag (!%p853_p7), [#allocation5], %s768_s29  ;;  %s180_s7 = scalar_lea.vmem (!%p853_p7), [#allocation4], %s340_s5 }
  0x56   : > { %538 = dma.done.wait (%p854_p12), %s177_s30, 256  }
  0x57   : > { %540 = vsyncadd (%p854_p12), %s177_s30, 4294967040  ;;  %p855_p4 = scmp.ne.s32.totalorder %s843_s19, 0 }
  0x59   : > { %542 = dma.done.wait (%p855_p4), [#allocation8], 256  }
  0x5a   : > { %544 = vsyncadd (%p855_p4), [#allocation8], 4294967040  ;;  %s204_s23 = scalar_lea.vmem [#allocation9], %s340_s5  ;;  %s349_s18 = sshll.u32 %s563_s0, 8  ;;  %v208_v0 = vld [vmem:[%s180_s7] sm:$0xff]  ;;  %v209_v2 = vld [vmem:[%s180_s7 + $0x8] sm:$0xff] }
  0x5b   : > { %s232_s17 = sshll.u32 %s204_s23, 4  ;;  %v210_v1 = vld [vmem:[#allocation7] sm:$0xff]  ;;  %v211_v4 = vld [vmem:[#allocation7 + $0x8] sm:$0xff]  ;;  %s786_s19 = scalar_lea.hbm %s838_s3, %s349_s18  ;;  %s781_s17 = int_to_ptr.vmem [resolvable:$true] %s232_s17 }
  0x5c   : > { %v212_v3 = vadd.f32 %v210_v1, %v208_v0  ;;  %v213_v5 = vadd.f32 %v211_v4, %v209_v2  ;;  %s217_s11 = scalar_lea.sflag [#allocation6], %s768_s29  ;;  %s485_s0 = scalar_lea.vmem %s781_s17, 256 }
  0x5d   : > { %p486_p3 = scmp.ne.s32.totalorder %s781_s17, %s485_s0  ;;  %s577_s24 = smov [#allocation9]  }
  0x5e   : > { %214 = vst [vmem:[%s204_s23] sm:$0xff] %v212_v3  ;;  %215 = vst [vmem:[%s204_s23 + $0x8] sm:$0xff] %v213_v5  ;;  %s489_s28 = sshll.u32 %s577_s24, 4  ;;  %s490_s28 = int_to_ptr.vmem [resolvable:$false] %s489_s28 }
  0x5f   : > { %p487_p6 = pnand %p486_p3, %p709_p10  ;;  %s491_s8 = scalar_lea.vmem %s490_s28, 512 }
  0x60   : > { %p492_p13 = scmp.lt.s32.totalorder %s781_s17, %s490_s28  ;;  %p493_p11 = scmp.lt.s32.totalorder %s491_s8, %s485_s0 }
  0x61   : > { %p488_p8 = pneg %p487_p6 }
  0x62   : > { %p494_p5 = por %p493_p11, %p492_p13 }
  0x64   : > { %p495_p9 = pnand %p494_p5, %p488_p8 }
  0x66   : > { %498 = shalt.err (!%p495_p9)
}
  0x67   : > { %s499_s25 = scalar_lea.hbm %s786_s19, 256  ;;  %s503_s4 = scalar_lea.hbm %s838_s3, 512 }
  0x68   : > { %p500_p0 = scmp.ne.s32.totalorder %s786_s19, %s499_s25  ;;  %p504_p7 = scmp.lt.u32.totalorder %s786_s19, %s838_s3 }
  0x69   : > { %p505_p12 = scmp.lt.u32.totalorder %s503_s4, %s499_s25  ;;  %p507_p3 = scmp.lt.u32.totalorder %s499_s25, %s786_s19 }
  0x6a   : > { %p501_p1 = pnand %p500_p0, %p709_p10 }
  0x6b   : > { %p506_p4 = por %p505_p12, %p504_p7 }
  0x6c   : > { %p502_p2 = pneg %p501_p1 }
  0x6d   : > { %p508_p6 = por %p507_p3, %p506_p4 }
  0x6f   : > { %p509_p8 = pnand %p508_p6, %p502_p2 }
  0x71   : > { %512 = shalt.err (!%p509_p8)
}
  0x72   : > { %s578_s7 = smov 128   ;;  %s579_s23 = smov 8  }
  0x73   : > { %356 = dma.vmem_to_hbm [thread:$0]  (%p709_p10), %s781_s17, 256, %s786_s19, %s217_s11, %s578_s7, %s578_s7, %s579_s23  }
  0x74 PF: > { %s247_s18 = sand.u32 1, %s551_s12   ;;  %p856_p13 = scmp.ne.s32.totalorder %s846_s22, 0 }
  0x75   : > { %p857_p11 = scmp.ge.s32.totalorder %s571_s16, 2  ;;  %s248_s21 = scalar_lea.sflag [#allocation6], %s247_s18 }
  0x77   : > { %p367_p5 = pnand %p857_p11, %p856_p13 }
  0x79   : > { %546 = dma.done.wait (!%p367_p5), %s248_s21, 256  }
  0x7a   : > { %548 = vsyncadd (!%p367_p5), %s248_s21, 4294967040  ;;  %s21_s16 = sadd.s32 1, %s571_s16   ;;  %s858_s12 = smov %s555_s13 }
  0x7b   : > { %p18_p9 = scmp.ge.s32.totalorder %s21_s16, 4   ;;  %s859_s13 = smov %s559_s14 }
  0x7c   : > { %s860_s14 = smov %s718_s6  ;;  %s861_s0 = smov %s567_s15 }
  0x7d   : > { %s862_s15 = smov %s864_s27  ;;  %20 = sbr.rel (!%p18_p9) target bundleno = 7 (0x7), region = 78 }
  0x84   :  { %253 = vsyncpa [#allocation5], 1 }
  0x85   :  { %255 = vsyncpa [#allocation5 + $0x1], 1 }
  0x86   :  { %256 = vsyncpa [#allocation8], 1 }
  0x87   :  { %257 = vsyncpa [#allocation6], 1 }
  0x88   :  { %259 = vsyncpa [#allocation6 + $0x1], 1 }

</bundles_post_ra>
